<compile_context>
chip_gen: v7x
topology: tpu7x:2x2x1
jax: 0.10.0
libtpu: 0.0.40
codegen_flags: <defaults>
</compile_context>

<pallas_src>
import jax
import jax.numpy as jnp
from jax.experimental import pallas as pl
from jax.experimental.pallas import tpu as pltpu

LANE = 128
SUBLANE = 8


def _round_up(n, m):
    return ((n + m - 1) // m) * m


def _mlp_kernel(x_ref, w1_ref, b1_ref, w2_ref, b2_ref, w3_ref, b3_ref, o_ref):
    # Cast activations to bf16 in-kernel (saves a wrapper-side HBM pass).
    x = x_ref[...].astype(jnp.bfloat16)
    # Layer 1: Linear (bf16 operands, f32 accumulation) + bias + ReLU in f32.
    h = jnp.dot(x, w1_ref[...], preferred_element_type=jnp.float32)
    h = jnp.maximum(h + b1_ref[...], 0.0)
    # Layer 2.
    h = jnp.dot(h.astype(jnp.bfloat16), w2_ref[...],
                preferred_element_type=jnp.float32)
    h = jnp.maximum(h + b2_ref[...], 0.0)
    # Layer 3: logits, no activation (matches the PyTorch forward).
    h = jnp.dot(h.astype(jnp.bfloat16), w3_ref[...],
                preferred_element_type=jnp.float32)
    o_ref[...] = (h + b3_ref[...]).astype(o_ref.dtype)


def prepare_params(w1, b1, w2, b2, w3, b3):
    """One-time parameter prep (call at load time, NOT per forward).

    Pads the hidden dim to the 128-lane width and casts weights to bf16.
    Weights are expected pre-transposed to (in_features, out_features).
    Returns a tuple of device arrays consumed by chat_neural_net_forward.
    """
    in_size, hidden = w1.shape
    out_size = w3.shape[1]
    hid_p = _round_up(hidden, LANE)

    def pad_w(w, rows, cols):
        w = jnp.asarray(w, jnp.float32)
        return jnp.pad(w, ((0, rows - w.shape[0]), (0, cols - w.shape[1])))

    def pad_b(b, cols):
        b = jnp.asarray(b, jnp.float32).reshape(1, -1)
        return jnp.pad(b, ((0, 0), (0, cols - b.shape[1])))

    w1_p = pad_w(w1, in_size, hid_p).astype(jnp.bfloat16)
    w2_p = pad_w(w2, hid_p, hid_p).astype(jnp.bfloat16)
    w3_p = pad_w(w3, hid_p, out_size).astype(jnp.bfloat16)   # true output width
    b1_p = pad_b(b1, hid_p)            # f32
    b2_p = pad_b(b2, hid_p)            # f32
    b3_p = pad_b(b3, out_size)         # f32, true output width
    return (w1_p, b1_p, w2_p, b2_p, w3_p, b3_p)


@jax.jit
def chat_neural_net_forward(x, params):
    """Fused 3-layer MLP forward.

    x      : (B, input_size) float32 (bag-of-words features), unpadded.
    params : output of prepare_params().
    returns (B, output_size) float32 logits.
    """
    w1_p, b1_p, w2_p, b2_p, w3_p, b3_p = params
    B, in_size = x.shape
    hid_p = w1_p.shape[1]
    out_size = w3_p.shape[1]
    assert w1_p.shape[0] == in_size

    # Batch tile: big enough to amortize per-step overhead, small enough to
    # leave >= 2 parallel grid steps (v7x megacore) once B is large.
    if B > 1024:
        tb = 1024
    else:
        tb = _round_up(B, SUBLANE)       # single step covering the whole batch
    nb = pl.cdiv(B, tb)                  # no batch padding; last tile may overhang

    x = jnp.asarray(x, jnp.float32)

    tiled = lambda shape: pl.BlockSpec(shape, lambda i: (i, 0))      # x / out
    resident = lambda shape: pl.BlockSpec(shape, lambda i: (0, 0))   # weights/bias

    # VMEM budget: resident weights/biases + double-buffered x/out tiles +
    # live f32 hidden intermediates (the previous estimate omitted these).
    weight_bytes = (w1_p.size + w2_p.size + w3_p.size) * 2 \
        + (b1_p.size + b2_p.size + b3_p.size) * 4
    tile_bytes = 2 * (tb * in_size * 4) + 2 * (tb * out_size * 4)
    interm_bytes = 3 * (tb * hid_p * 4)
    vmem_limit = min(32 * 1024 * 1024,
                     max(4 * 1024 * 1024,
                         2 * (weight_bytes + tile_bytes + interm_bytes)))

    out = pl.pallas_call(
        _mlp_kernel,
        out_shape=jax.ShapeDtypeStruct((B, out_size), jnp.float32),
        grid=(nb,),
        in_specs=[
            tiled((tb, in_size)),                         # x, unpadded lanes
            resident(w1_p.shape), resident(b1_p.shape),
            resident(w2_p.shape), resident(b2_p.shape),
            resident(w3_p.shape), resident(b3_p.shape),
        ],
        out_specs=tiled((tb, out_size)),                  # true-width output
        compiler_params=pltpu.CompilerParams(
            dimension_semantics=("parallel",),
            vmem_limit_bytes=int(vmem_limit),
        ),
    )(x, w1_p, b1_p, w2_p, b2_p, w3_p, b3_p)
    return out


def init_linear_params(key, in_features, out_features):
    """Deterministic nn.Linear-style init (uniform +/- 1/sqrt(fan_in)).

    Weight returned pre-transposed to (in_features, out_features); bias (1, out).
    """
    kw, kb = jax.random.split(key)
    bound = 1.0 / jnp.sqrt(jnp.float32(in_features))
    w = jax.random.uniform(kw, (in_features, out_features), jnp.float32, -bound, bound)
    b = jax.random.uniform(kb, (1, out_features), jnp.float32, -bound, bound)
    return w, b


if __name__ == "__main__":
    # Small shapes consistent with the module: bag-of-words -> hidden -> classes.
    batch = 8
    input_size = 64
    hidden_size = 32
    output_size = 16

    key = jax.random.PRNGKey(0)
    kx, k1, k2, k3 = jax.random.split(key, 4)

    x = jax.random.uniform(kx, (batch, input_size), jnp.float32)
    w1, b1 = init_linear_params(k1, input_size, hidden_size)
    w2, b2 = init_linear_params(k2, hidden_size, hidden_size)
    w3, b3 = init_linear_params(k3, hidden_size, output_size)

    params = prepare_params(w1, b1, w2, b2, w3, b3)   # one-time, outside the jit
    out = chat_neural_net_forward(x, params)
    out = jax.block_until_ready(out)

    # Pure-JAX f32 reference (same math as the PyTorch forward). The kernel uses
    # bf16 matmul operands with f32 accumulation, so tolerance is bf16-level.
    h = jnp.maximum(x @ w1 + b1, 0.0)
    h = jnp.maximum(h @ w2 + b2, 0.0)
    ref = h @ w3 + b3

    assert out.shape == (batch, output_size)
    assert jnp.allclose(out, ref, atol=2e-2, rtol=2e-2), (
        f"max abs err {jnp.max(jnp.abs(out - ref))}")

    print("KERNEL_OK")
</pallas_src>

<mosaic_0001>
module attributes {stable_mosaic.version = 11 : i64} {
  func.func @_mlp_kernel(%arg0: i32, %arg1: memref<8x64xf32, #tpu.memory_space<vmem>>, %arg2: memref<64x128xbf16, #tpu.memory_space<vmem>>, %arg3: memref<1x128xf32, #tpu.memory_space<vmem>>, %arg4: memref<128x128xbf16, #tpu.memory_space<vmem>>, %arg5: memref<1x128xf32, #tpu.memory_space<vmem>>, %arg6: memref<128x16xbf16, #tpu.memory_space<vmem>>, %arg7: memref<1x16xf32, #tpu.memory_space<vmem>>, %arg8: memref<8x16xf32, #tpu.memory_space<vmem>>) attributes {dimension_semantics = [#tpu.dimension_semantics<parallel>], iteration_bounds = array<i64: 1>, scalar_prefetch = 0 : i64, scratch_operands = 0 : i64, tpu.core_type = #tpu.core_type<tc>, window_params = [{transform_indices = @transform_0, window_bounds = array<i64: 8, 64>}, {pipeline_mode = #tpu.pipeline_mode<synchronous>, transform_indices = @transform_1, window_bounds = array<i64: 64, 128>}, {pipeline_mode = #tpu.pipeline_mode<synchronous>, transform_indices = @transform_2, window_bounds = array<i64: 1, 128>}, {pipeline_mode = #tpu.pipeline_mode<synchronous>, transform_indices = @transform_3, window_bounds = array<i64: 128, 128>}, {pipeline_mode = #tpu.pipeline_mode<synchronous>, transform_indices = @transform_4, window_bounds = array<i64: 1, 128>}, {pipeline_mode = #tpu.pipeline_mode<synchronous>, transform_indices = @transform_5, window_bounds = array<i64: 128, 16>}, {pipeline_mode = #tpu.pipeline_mode<synchronous>, transform_indices = @transform_6, window_bounds = array<i64: 1, 16>}, {transform_indices = @transform_7, window_bounds = array<i64: 8, 16>}]} {
    %c0 = arith.constant 0 : index
    %c0_0 = arith.constant 0 : index
    %0 = vector.load %arg1[%c0, %c0_0] : memref<8x64xf32, #tpu.memory_space<vmem>>, vector<8x64xf32>
    %1 = arith.truncf %0 : vector<8x64xf32> to vector<8x64xbf16>
    %c0_1 = arith.constant 0 : index
    %c0_2 = arith.constant 0 : index
    %2 = vector.load %arg2[%c0_1, %c0_2] : memref<64x128xbf16, #tpu.memory_space<vmem>>, vector<64x128xbf16>
    %cst = arith.constant dense<0.000000e+00> : vector<8x128xf32>
    %3 = tpu.matmul %1, %2, %cst {dimension_numbers = #tpu.dot_dimension_numbers<[1], [0], [0], [1], [0, 0, 1, 1], [], []>} : vector<8x64xbf16>, vector<64x128xbf16>, vector<8x128xf32> -> vector<8x128xf32>
    %c0_3 = arith.constant 0 : index
    %c0_4 = arith.constant 0 : index
    %4 = vector.load %arg3[%c0_3, %c0_4] : memref<1x128xf32, #tpu.memory_space<vmem>>, vector<1x128xf32>
    %5 = vector.broadcast %4 : vector<1x128xf32> to vector<8x128xf32>
    %6 = arith.addf %3, %5 : vector<8x128xf32>
    %cst_5 = arith.constant 0.000000e+00 : f32
    %7 = vector.broadcast %cst_5 : f32 to vector<8x128xf32>
    %8 = arith.maximumf %6, %7 : vector<8x128xf32>
    %9 = arith.truncf %8 : vector<8x128xf32> to vector<8x128xbf16>
    %c0_6 = arith.constant 0 : index
    %c0_7 = arith.constant 0 : index
    %10 = vector.load %arg4[%c0_6, %c0_7] : memref<128x128xbf16, #tpu.memory_space<vmem>>, vector<128x128xbf16>
    %cst_8 = arith.constant dense<0.000000e+00> : vector<8x128xf32>
    %11 = tpu.matmul %9, %10, %cst_8 {dimension_numbers = #tpu.dot_dimension_numbers<[1], [0], [0], [1], [0, 0, 1, 1], [], []>} : vector<8x128xbf16>, vector<128x128xbf16>, vector<8x128xf32> -> vector<8x128xf32>
    %c0_9 = arith.constant 0 : index
    %c0_10 = arith.constant 0 : index
    %12 = vector.load %arg5[%c0_9, %c0_10] : memref<1x128xf32, #tpu.memory_space<vmem>>, vector<1x128xf32>
    %13 = vector.broadcast %12 : vector<1x128xf32> to vector<8x128xf32>
    %14 = arith.addf %11, %13 : vector<8x128xf32>
    %cst_11 = arith.constant 0.000000e+00 : f32
    %15 = vector.broadcast %cst_11 : f32 to vector<8x128xf32>
    %16 = arith.maximumf %14, %15 : vector<8x128xf32>
    %17 = arith.truncf %16 : vector<8x128xf32> to vector<8x128xbf16>
    %c0_12 = arith.constant 0 : index
    %c0_13 = arith.constant 0 : index
    %18 = vector.load %arg6[%c0_12, %c0_13] : memref<128x16xbf16, #tpu.memory_space<vmem>>, vector<128x16xbf16>
    %cst_14 = arith.constant dense<0.000000e+00> : vector<8x16xf32>
    %19 = tpu.matmul %17, %18, %cst_14 {dimension_numbers = #tpu.dot_dimension_numbers<[1], [0], [0], [1], [0, 0, 1, 1], [], []>} : vector<8x128xbf16>, vector<128x16xbf16>, vector<8x16xf32> -> vector<8x16xf32>
    %c0_15 = arith.constant 0 : index
    %c0_16 = arith.constant 0 : index
    %20 = vector.load %arg7[%c0_15, %c0_16] : memref<1x16xf32, #tpu.memory_space<vmem>>, vector<1x16xf32>
    %21 = vector.broadcast %20 : vector<1x16xf32> to vector<8x16xf32>
    %22 = arith.addf %19, %21 : vector<8x16xf32>
    %c0_17 = arith.constant 0 : index
    %c0_18 = arith.constant 0 : index
    %23 = vector.load %arg8[%c0_17, %c0_18] : memref<8x16xf32, #tpu.memory_space<vmem>>, vector<8x16xf32>
    tpu.vector_store %arg8[%c0_17, %c0_18], %22 {strides = array<i32>} : memref<8x16xf32, #tpu.memory_space<vmem>>, vector<8x16xf32>,
    return
  }
  func.func @transform_0(%arg0: i32) -> (i32, i32) {
    %c0_i32 = arith.constant 0 : i32
    %c0_i32_0 = arith.constant 0 : i32
    return %arg0, %c0_i32 : i32, i32
  }
  func.func @transform_1(%arg0: i32) -> (i32, i32) {
    %c0_i32 = arith.constant 0 : i32
    %c0_i32_0 = arith.constant 0 : i32
    %c0_i32_1 = arith.constant 0 : i32
    return %c0_i32, %c0_i32_0 : i32, i32
  }
  func.func @transform_2(%arg0: i32) -> (i32, i32) {
    %c0_i32 = arith.constant 0 : i32
    %c0_i32_0 = arith.constant 0 : i32
    %c0_i32_1 = arith.constant 0 : i32
    return %c0_i32, %c0_i32_0 : i32, i32
  }
  func.func @transform_3(%arg0: i32) -> (i32, i32) {
    %c0_i32 = arith.constant 0 : i32
    %c0_i32_0 = arith.constant 0 : i32
    %c0_i32_1 = arith.constant 0 : i32
    return %c0_i32, %c0_i32_0 : i32, i32
  }
  func.func @transform_4(%arg0: i32) -> (i32, i32) {
    %c0_i32 = arith.constant 0 : i32
    %c0_i32_0 = arith.constant 0 : i32
    %c0_i32_1 = arith.constant 0 : i32
    return %c0_i32, %c0_i32_0 : i32, i32
  }
  func.func @transform_5(%arg0: i32) -> (i32, i32) {
    %c0_i32 = arith.constant 0 : i32
    %c0_i32_0 = arith.constant 0 : i32
    %c0_i32_1 = arith.constant 0 : i32
    return %c0_i32, %c0_i32_0 : i32, i32
  }
  func.func @transform_6(%arg0: i32) -> (i32, i32) {
    %c0_i32 = arith.constant 0 : i32
    %c0_i32_0 = arith.constant 0 : i32
    %c0_i32_1 = arith.constant 0 : i32
    return %c0_i32, %c0_i32_0 : i32, i32
  }
  func.func @transform_7(%arg0: i32) -> (i32, i32) {
    %c0_i32 = arith.constant 0 : i32
    %c0_i32_0 = arith.constant 0 : i32
    return %arg0, %c0_i32 : i32, i32
  }
}

</mosaic_0001>

<bundles_post_ra>
// kernel: chat_neural_net_forward.1
= control target key start
LH: loop header
LB: loop body
LE: loop exit
PB: predicated region body
PF: predicated region fallthrough
CT: control target
= control target key end

     0   :  { %12 = vsyncpa [#allocation3], 0  ;;  %s699_s0 = inlined_call_operand.vmem [shape: f32[8,64], index: 0, kind: input, shape index: {}]   ;;  %s700_s1 = inlined_call_operand.hbm [shape: bf16[64,128], index: 1, kind: input, shape index: {}]   ;;  %s701_s2 = inlined_call_operand.vmem [shape: f32[1,128], index: 2, kind: input, shape index: {}]   ;;  %s702_s3 = inlined_call_operand.vmem [shape: bf16[128,128], index: 3, kind: input, shape index: {}]   ;;  %s703_s4 = inlined_call_operand.vmem [shape: f32[1,128], index: 4, kind: input, shape index: {}]   ;;  %s704_s5 = inlined_call_operand.vmem [shape: bf16[128,16], index: 5, kind: input, shape index: {}]   ;;  %s705_s6 = inlined_call_operand.vmem [shape: f32[1,16], index: 6, kind: input, shape index: {}]   ;;  %s706_s7 = inlined_call_operand.hbm [shape: f32[8,16], index: 7, kind: output, shape index: {}]  }
   0x1   :  { %13 = vsyncpa [#allocation4], 0  ;;  %s543_s24 = smov [#allocation2]   ;;  %s495_s28 = scalar_lea.hbm %s700_s1, 512 }
   0x2   :  { %s21_s25 = sshll.u32 %s543_s24, 4  ;;  %p496_p0 = scmp.ne.s32.totalorder %s700_s1, %s495_s28  ;;  %s22_s25 = int_to_ptr.vmem [resolvable:$true] %s21_s25 }
   0x3   :  { %p499_p1 = scmp.lt.u32.totalorder %s495_s28, %s700_s1 }
   0x5   :  { %p501_p2 = pnand %p499_p1, %p496_p0 }
   0x7   :  { %504 = shalt.err (!%p501_p2)
}
   0x8   :  { %s505_s10 = scalar_lea.vmem %s22_s25, 512  ;;  %p510_p4 = scmp.lt.s32.totalorder %s22_s25, %s22_s25 }
   0x9   :  { %p506_p3 = scmp.ne.s32.totalorder %s22_s25, %s505_s10  ;;  %p511_p5 = scmp.lt.s32.totalorder %s505_s10, %s505_s10 }
   0xb   :  { %p512_p6 = por %p511_p5, %p510_p4 }
   0xd   :  { %p513_p7 = pnand %p512_p6, %p506_p3 }
   0xf   :  { %516 = shalt.err (!%p513_p7)
}
  0x10   :  { %s544_s11 = smov 64   ;;  %s545_s12 = smov 4  }
  0x11   :  { %27 = dma.hbm_to_vmem [thread:$0]  %s700_s1, 512, %s22_s25, [#allocation3], %s544_s11, %s544_s11, %s545_s12  }
  0x12   :  { %539 = dma.done.wait [#allocation3], 512  }
  0x13   :  { %540 = vsyncadd [#allocation3], 4294966784  ;;  %v546_v0 = vmov 0.0   ;;  %vm547_vm0 = vmmov 0   ;;  %v475_v1 = vld [vmem:[#allocation2] sm:$0xff]   ;;  %v476_v2 = vld [vmem:[#allocation2 + $0x8] sm:$0xff]  }
  0x14   :  { %417 = vmatprep.subr.bf16.mxu0 %v546_v0  ;;  %425 = vmatprep.mubr.msk.bf16.mxu0 %vm547_vm0, %v546_v0  ;;  %v479_v3 = vld [vmem:[%s702_s3] sm:$0xff]   ;;  %v477_v4 = vld [vmem:[#allocation2 + $0x10] sm:$0xff]   ;;  %v480_v5 = vld [vmem:[%s702_s3 + $0x8] sm:$0xff]   ;;  %vm83_vm1 = vcmask 523264   ;;  %s548_s26 = smov [#allocation5]   ;;  %vm353_vm2 = vcmask 130048  }
  0x15   :  { %429 = vmatprep.subr.bf16.mxu1 %v546_v0  ;;  %445 = vmatprep.mubr.msk.bf16.mxu1 %vm547_vm0, %v546_v0  ;;  %v478_v6 = vld [vmem:[#allocation2 + $0x18] sm:$0xff]   ;;  %v42_v7 = vld [vmem:[%s699_s0] sm:$0xff]  ;;  %v481_v8 = vld [vmem:[%s702_s3 + $0x10] sm:$0xff]   ;;  %s361_s27 = sshll.u32 %s548_s26, 4  ;;  %s362_s27 = int_to_ptr.vmem [resolvable:$true] %s361_s27 }
  0x16   :  { %418 = vmatpush3.bf16.msra.mxu0 %v475_v1  ;;  %430 = vmatpush3.bf16.msra.mxu1 %v479_v3  ;;  %v43_v9 = vpack.c.bf16 %v42_v7, %v42_v7  ;;  %v482_v10 = vld [vmem:[%s702_s3 + $0x18] sm:$0xff]   ;;  %v483_v11 = vld [vmem:[%s702_s3 + $0x20] sm:$0xff]   ;;  %v484_v12 = vld [vmem:[%s702_s3 + $0x28] sm:$0xff]   ;;  %p522_p9 = scmp.lt.s32.totalorder %s362_s27, %s362_s27 }
  0x17   :  { %419 = vmatprep.subr.bf16.mxu0 %v546_v0  ;;  %431 = vmatprep.subr.bf16.mxu1 %v546_v0  ;;  %v485_v13 = vld [vmem:[%s702_s3 + $0x30] sm:$0xff]   ;;  %v486_v14 = vld [vmem:[%s702_s3 + $0x38] sm:$0xff]   ;;  %v487_v15 = vld [vmem:[%s704_s5] sm:$0xff]  }
  0x18   :  { %v488_v16 = vld [vmem:[%s704_s5 + $0x8] sm:$0xff]   ;;  %v489_v17 = vld [vmem:[%s704_s5 + $0x10] sm:$0xff]   ;;  %v490_v18 = vld [vmem:[%s704_s5 + $0x18] sm:$0xff]  }
  0x19   :  { %v491_v19 = vld [vmem:[%s704_s5 + $0x20] sm:$0xff]   ;;  %v492_v20 = vld [vmem:[%s704_s5 + $0x28] sm:$0xff]   ;;  %v493_v29 = vld [vmem:[%s704_s5 + $0x30] sm:$0xff]  }
  0x1a   :  { %420 = vmatpush3.bf16.msra.mxu0 %v476_v2  ;;  %432 = vmatpush3.bf16.msra.mxu1 %v480_v5  ;;  %v370_v21 = vld [vmem:[%s701_s2] ss:$0 sm:$0xff]  ;;  %v494_v30 = vld [vmem:[%s704_s5 + $0x38] sm:$0xff]  }
  0x1b   :  { %421 = vmatprep.subr.bf16.mxu0 %v546_v0  ;;  %433 = vmatprep.subr.bf16.mxu1 %v546_v0  ;;  %v376_v31 = vld [vmem:[%s703_s4] ss:$0 sm:$0xff]  ;;  %s517_s4 = scalar_lea.vmem %s362_s27, 128 }
  0x1c   :  { %v385_v39 = vld [vmem:[%s705_s6] ss:$0 sm:$0xff]  ;;  %p518_p8 = scmp.ne.s32.totalorder %s362_s27, %s517_s4  ;;  %p523_p10 = scmp.lt.s32.totalorder %s517_s4, %s517_s4 }
  0x1e   :  { %422 = vmatpush3.bf16.msra.mxu0 %v477_v4  ;;  %434 = vmatpush3.bf16.msra.mxu1 %v481_v8  ;;  %p524_p11 = por %p523_p10, %p522_p9 }
  0x1f   :  { %423 = vmatprep.subr.bf16.mxu0 %v546_v0  ;;  %435 = vmatprep.subr.bf16.mxu1 %v546_v0 }
  0x20   :  { %p525_p12 = pnand %p524_p11, %p518_p8 }
  0x22   :  { %424 = vmatpush3.bf16.msra.mxu0 %v478_v6  ;;  %436 = vmatpush3.bf16.msra.mxu1 %v482_v10 }
  0x23   :  { %449 = vmatprep.subr.bf16.mxu0 %v546_v0  ;;  %437 = vmatprep.subr.bf16.mxu1 %v546_v0 }
  0x25   :  { %426 = vmatmul.mubr.msk.bf16.vlgmr.msra.gmra.mrb[0].mxu0 %vm83_vm1, %v43_v9 }
  0x26   :  { %465 = vmatprep.mubr.msk.bf16.mxu0 %vm547_vm0, %v546_v0  ;;  %438 = vmatpush3.bf16.msra.mxu1 %v483_v11 }
  0x27   :  { %439 = vmatprep.subr.bf16.mxu1 %v546_v0  ;;  %450 = vmatpush3.bf16.msra.mxu0 %v487_v15 }
  0x28   :  { %451 = vmatprep.subr.bf16.mxu0 %v546_v0 }
  0x2a   :  { %440 = vmatpush3.bf16.msra.mxu1 %v484_v12 }
  0x2b   :  { %441 = vmatprep.subr.bf16.mxu1 %v546_v0  ;;  %452 = vmatpush3.bf16.msra.mxu0 %v488_v16 }
  0x2c   :  { %453 = vmatprep.subr.bf16.mxu0 %v546_v0 }
  0x2e   :  { %442 = vmatpush3.bf16.msra.mxu1 %v485_v13 }
  0x2f   :  { %443 = vmatprep.subr.bf16.mxu1 %v546_v0  ;;  %454 = vmatpush3.bf16.msra.mxu0 %v489_v17 }
  0x30   :  { %455 = vmatprep.subr.bf16.mxu0 %v546_v0 }
  0x32   :  { %444 = vmatpush3.bf16.msra.mxu1 %v486_v14 }
  0x33   :  { %456 = vmatpush3.bf16.msra.mxu0 %v490_v18 }
  0x34   :  { %457 = vmatprep.subr.bf16.mxu0 %v546_v0 }
  0x37   :  { %458 = vmatpush3.bf16.msra.mxu0 %v491_v19 }
  0x38   :  { %459 = vmatprep.subr.bf16.mxu0 %v546_v0 }
  0x3b   :  { %460 = vmatpush3.bf16.msra.mxu0 %v492_v20 }
  0x3c   :  { %461 = vmatprep.subr.bf16.mxu0 %v546_v0 }
  0x3f   :  { %462 = vmatpush3.bf16.msra.mxu0 %v493_v29 }
  0x40   :  { %463 = vmatprep.subr.bf16.mxu0 %v546_v0 }
  0x43   :  { %464 = vmatpush3.bf16.msra.mxu0 %v494_v30 }
  0xf8   :  { %v121_v22 = vpop.f32.mrb[0].mxu0 }
  0xf9   :  { %v122_v23 = vadd.f32 %v370_v21, %v121_v22  ;;  %v427_v24 = vpop.f32.mrb[1].mxu0 }
  0xfa   :  { %v124_v25 = vpop.f32.mrb[2].mxu0 }
  0xfb   :  { %v127_v26 = vmax.f32 %v122_v23, 0.0  ;;  %v428_v27 = vpop.f32.mrb[3].mxu0 }
  0xfd   :  { %v128_v28 = vpack.c.bf16 %v127_v26, %v127_v26 }
  0xff   :  { %446 = vmatmul.mubr.bf16.vlgmr.msra.gmra.mrb[0].mxu1 %v128_v28 }
 0x1d2   :  { %v234_v32 = vpop.f32.mrb[0].mxu1 }
 0x1d3   :  { %v235_v33 = vadd.f32 %v376_v31, %v234_v32  ;;  %v447_v34 = vpop.f32.mrb[1].mxu1 }
 0x1d4   :  { %v237_v35 = vpop.f32.mrb[2].mxu1 }
 0x1d5   :  { %v240_v36 = vmax.f32 %v235_v33, 0.0  ;;  %v448_v37 = vpop.f32.mrb[3].mxu1 }
 0x1d7   :  { %v241_v38 = vpack.c.bf16 %v240_v36, %v240_v36 }
 0x1d9   :  { %466 = vmatmul.mubr.bf16.vlgmr.msra.gmra.mrb[4].mxu0 %v241_v38 }
 0x2ac   :  { %v347_v40 = vpop.f32.mrb[4].mxu0 }
 0x2ad   :  { %v348_v41 = vadd.f32 %v385_v39, %v347_v40  ;;  %v467_v42 = vpop.f32.mrb[5].mxu0 }
 0x2ae   :  { %v350_v43 = vpop.f32.mrb[6].mxu0 }
 0x2af   :  { %v468_v44 = vpop.f32.mrb[7].mxu0  ;;  %354 = vst.msk [vmem:[#allocation5] sm:$0xff] %vm353_vm2, %v348_v41 }
 0x2b0   :  { %528 = shalt.err (!%p525_p12)
}
 0x2b1   :  { %s529_s6 = scalar_lea.hbm %s706_s7, 128 }
 0x2b2   :  { %p530_p13 = scmp.ne.s32.totalorder %s706_s7, %s529_s6  ;;  %p533_p0 = scmp.lt.u32.totalorder %s529_s6, %s706_s7 }
 0x2b4   :  { %p535_p1 = pnand %p533_p0, %p530_p13 }
 0x2b6   :  { %538 = shalt.err (!%p535_p1)
}
 0x2b7   :  { %364 = dma.vmem_to_hbm [thread:$0]  %s362_s27, 128, %s706_s7, [#allocation4]  }
 0x2b8   :  { %541 = dma.done.wait [#allocation4], 128  }
 0x2b9   :  { %542 = vsyncadd [#allocation4], 4294967168 }
 0x2ba   :  { %368 = vsyncpa [#allocation3], 1 }
 0x2bb   :  { %369 = vsyncpa [#allocation4], 1 }

</bundles_post_ra>
